<compile_context>
chip_gen: v7x
topology: tpu7x:2x2x1
jax: 0.10.0
libtpu: 0.0.40
codegen_flags: <defaults>
</compile_context>

<pallas_src>
import jax
import jax.numpy as jnp
from jax.experimental import pallas as pl
from jax.experimental.pallas import tpu as pltpu


B_TILE = 16  # batch rows per grid step (16 sublanes -> native bf16 packing)


def _round_up(x, m):
    return (x + m - 1) // m * m


def _pad2d(x, rows, cols):
    r, c = x.shape
    if r == rows and c == cols:
        return x
    return jnp.pad(x, ((0, rows - r), (0, cols - c)))


def simplenet_kernel(ids_ref, emb_ref, w1_ref, b1_ref, w2_ref, b2_ref, out_ref):
    b_tile, seq_len = ids_ref.shape
    v_pad = emb_ref.shape[0]

    ids = ids_ref[...]                                          # (B_TILE, S) int32

    # Per-example token-count histogram (one-hot over the padded vocab).
    # The sum of embeddings is then a single MXU matmul against the resident
    # table:  sum_s emb[ids[b, s]] == counts[b, :] @ emb.
    vocab_iota = jax.lax.broadcasted_iota(jnp.int32, (b_tile, seq_len, v_pad), 2)
    onehot = (ids[:, :, None] == vocab_iota).astype(jnp.float32)
    counts = jnp.sum(onehot, axis=1)                            # (B_TILE, V_pad)

    summed = jnp.dot(counts.astype(jnp.bfloat16), emb_ref[...],
                     preferred_element_type=jnp.float32)        # (B_TILE, H_pad)
    x = summed * (1.0 / seq_len)                                # exact mean (sum then scale)

    h = jnp.dot(x.astype(jnp.bfloat16), w1_ref[...],
                preferred_element_type=jnp.float32) + b1_ref[...]
    h = jnp.maximum(h, 0.0)
    out = jnp.dot(h.astype(jnp.bfloat16), w2_ref[...],
                  preferred_element_type=jnp.float32) + b2_ref[...]
    out_ref[...] = out.astype(out_ref.dtype)


def prepare_params(emb, w1, b1, w2, b2):
    """Pad/cast the model parameters ONCE (hoisted out of the per-call path).

    Linear weights are stored as (in_features, out_features): y = x @ W + b
    (i.e. PyTorch nn.Linear weight transposed).
    """
    V, H = emb.shape
    O = w2.shape[1]
    V_pad = _round_up(V, 128)   # contraction dim of counts @ emb
    H_pad = _round_up(H, 128)
    O_pad = _round_up(O, 128)

    f32 = jnp.float32
    emb_bf = _pad2d(emb.astype(f32), V_pad, H_pad).astype(jnp.bfloat16)
    w1_bf = _pad2d(w1.astype(f32), H_pad, H_pad).astype(jnp.bfloat16)
    w2_bf = _pad2d(w2.astype(f32), H_pad, O_pad).astype(jnp.bfloat16)
    b1_p = _pad2d(b1.astype(f32).reshape(1, -1), 1, H_pad)
    b2_p = _pad2d(b2.astype(f32).reshape(1, -1), 1, O_pad)
    return dict(emb=emb_bf, w1=w1_bf, b1=b1_p, w2=w2_bf, b2=b2_p,
                dims=(V, H, O, V_pad, H_pad, O_pad))


def simplenet_forward(ids, params):
    """ids: (B, S) int32 token ids. Returns (B, O) float32."""
    emb_bf = params["emb"]
    w1_bf, b1_p = params["w1"], params["b1"]
    w2_bf, b2_p = params["w2"], params["b2"]
    V, H, O, V_pad, H_pad, O_pad = params["dims"]

    B, S = ids.shape
    B_pad = _round_up(B, B_TILE)
    nb = B_pad // B_TILE

    # Pad batch with token id 0 rows; their outputs are sliced off below.
    ids_p = jnp.zeros((B_pad, S), jnp.int32).at[:B, :].set(ids.astype(jnp.int32))

    cost = pl.CostEstimate(
        flops=(2 * B_pad * V_pad * H_pad        # counts @ emb
               + 2 * B_pad * H_pad * H_pad      # fc1
               + 2 * B_pad * H_pad * O_pad),    # fc2
        transcendentals=0,
        bytes_accessed=(4 * B_pad * S
                        + 2 * V_pad * H_pad
                        + 2 * H_pad * H_pad + 4 * H_pad
                        + 2 * H_pad * O_pad + 4 * O_pad
                        + 4 * B_pad * O_pad),
    )

    out_pad = pl.pallas_call(
        simplenet_kernel,
        out_shape=jax.ShapeDtypeStruct((B_pad, O_pad), jnp.float32),
        grid=(nb,),
        in_specs=[
            # Per-step batch tile of token ids.
            pl.BlockSpec((B_TILE, S), lambda i: (i, 0)),
            # Whole (small) embedding table + weights/biases: constant-index
            # blocks, DMA'd once and kept resident across the batch tiles.
            pl.BlockSpec((V_pad, H_pad), lambda i: (0, 0)),
            pl.BlockSpec((H_pad, H_pad), lambda i: (0, 0)),
            pl.BlockSpec((1, H_pad), lambda i: (0, 0)),
            pl.BlockSpec((H_pad, O_pad), lambda i: (0, 0)),
            pl.BlockSpec((1, O_pad), lambda i: (0, 0)),
        ],
        out_specs=pl.BlockSpec((B_TILE, O_pad), lambda i: (i, 0)),
        compiler_params=pltpu.CompilerParams(
            # Each batch tile is independent -> parallel (v7x megacore).
            dimension_semantics=("parallel",),
            vmem_limit_bytes=32 * 1024 * 1024,
        ),
        cost_estimate=cost,
    )(ids_p, emb_bf, w1_bf, b1_p, w2_bf, b2_p)

    return out_pad[:B, :O]


def reference_forward(ids, emb, w1, b1, w2, b2):
    x = emb[ids]                 # (B, S, H)
    x = x.mean(axis=1)           # (B, H)
    x = x @ w1 + b1
    x = jnp.maximum(x, 0.0)
    return x @ w2 + b2


if __name__ == "__main__":
    # Small deterministic shapes consistent with SimpleNet's forward.
    B, S = 2, 8                  # batch, sequence length
    V, H, O = 32, 32, 16         # vocab_size, hidden_size, output_size

    key = jax.random.PRNGKey(0)
    k_ids, k_emb, k_w1, k_b1, k_w2, k_b2 = jax.random.split(key, 6)

    ids = jax.random.randint(k_ids, (B, S), 0, V, dtype=jnp.int32)
    emb = jax.random.normal(k_emb, (V, H), dtype=jnp.float32) * 0.1
    w1 = jax.random.normal(k_w1, (H, H), dtype=jnp.float32) * 0.1
    b1 = jax.random.normal(k_b1, (H,), dtype=jnp.float32) * 0.1
    w2 = jax.random.normal(k_w2, (H, O), dtype=jnp.float32) * 0.1
    b2 = jax.random.normal(k_b2, (O,), dtype=jnp.float32) * 0.1

    params = prepare_params(emb, w1, b1, w2, b2)   # pad/cast once, reuse
    out = jax.block_until_ready(simplenet_forward(ids, params))
    ref = reference_forward(ids, emb, w1, b1, w2, b2)

    assert out.shape == (B, O)
    # bf16 MXU operands with f32 accumulation -> tolerance sized for bf16.
    assert jnp.allclose(out, ref, atol=1e-2, rtol=1e-2), "mismatch vs reference"

    print("KERNEL_OK")
</pallas_src>

<mosaic_0001>
module attributes {stable_mosaic.version = 11 : i64} {
  func.func @simplenet_kernel(%arg0: i32, %arg1: memref<16x8xi32, #tpu.memory_space<vmem>>, %arg2: memref<128x128xbf16, #tpu.memory_space<vmem>>, %arg3: memref<128x128xbf16, #tpu.memory_space<vmem>>, %arg4: memref<1x128xf32, #tpu.memory_space<vmem>>, %arg5: memref<128x128xbf16, #tpu.memory_space<vmem>>, %arg6: memref<1x128xf32, #tpu.memory_space<vmem>>, %arg7: memref<16x128xf32, #tpu.memory_space<vmem>>) attributes {dimension_semantics = [#tpu.dimension_semantics<parallel>], iteration_bounds = array<i64: 1>, scalar_prefetch = 0 : i64, scratch_operands = 0 : i64, tpu.core_type = #tpu.core_type<tc>, window_params = [{transform_indices = @transform_0, window_bounds = array<i64: 16, 8>}, {pipeline_mode = #tpu.pipeline_mode<synchronous>, transform_indices = @transform_1, window_bounds = array<i64: 128, 128>}, {pipeline_mode = #tpu.pipeline_mode<synchronous>, transform_indices = @transform_2, window_bounds = array<i64: 128, 128>}, {pipeline_mode = #tpu.pipeline_mode<synchronous>, transform_indices = @transform_3, window_bounds = array<i64: 1, 128>}, {pipeline_mode = #tpu.pipeline_mode<synchronous>, transform_indices = @transform_4, window_bounds = array<i64: 128, 128>}, {pipeline_mode = #tpu.pipeline_mode<synchronous>, transform_indices = @transform_5, window_bounds = array<i64: 1, 128>}, {transform_indices = @transform_6, window_bounds = array<i64: 16, 128>}]} {
    %c0 = arith.constant 0 : index
    %c0_0 = arith.constant 0 : index
    %0 = vector.load %arg1[%c0, %c0_0] : memref<16x8xi32, #tpu.memory_space<vmem>>, vector<16x8xi32>
    %1 = tpu.iota {dimensions = array<i32: 2>} : vector<16x8x128xi32>
    %2 = vector.shape_cast %0 : vector<16x8xi32> to vector<16x8x1xi32>
    %3 = vector.broadcast %2 : vector<16x8x1xi32> to vector<16x8x128xi32>
    %4 = arith.cmpi eq, %3, %1 : vector<16x8x128xi32>
    %5 = arith.extui %4 : vector<16x8x128xi1> to vector<16x8x128xi32>
    %6 = arith.sitofp %5 : vector<16x8x128xi32> to vector<16x8x128xf32>
    %cst = arith.constant dense<0.000000e+00> : vector<16x128xf32>
    %7 = vector.multi_reduction <add>, %6, %cst [1] : vector<16x8x128xf32> to vector<16x128xf32>
    %8 = arith.truncf %7 : vector<16x128xf32> to vector<16x128xbf16>
    %c0_1 = arith.constant 0 : index
    %c0_2 = arith.constant 0 : index
    %9 = vector.load %arg2[%c0_1, %c0_2] : memref<128x128xbf16, #tpu.memory_space<vmem>>, vector<128x128xbf16>
    %cst_3 = arith.constant dense<0.000000e+00> : vector<16x128xf32>
    %10 = tpu.matmul %8, %9, %cst_3 {dimension_numbers = #tpu.dot_dimension_numbers<[1], [0], [0], [1], [0, 0, 1, 1], [], []>} : vector<16x128xbf16>, vector<128x128xbf16>, vector<16x128xf32> -> vector<16x128xf32>
    %cst_4 = arith.constant 1.250000e-01 : f32
    %11 = vector.broadcast %cst_4 : f32 to vector<16x128xf32>
    %12 = arith.mulf %10, %11 : vector<16x128xf32>
    %13 = arith.truncf %12 : vector<16x128xf32> to vector<16x128xbf16>
    %c0_5 = arith.constant 0 : index
    %c0_6 = arith.constant 0 : index
    %14 = vector.load %arg3[%c0_5, %c0_6] : memref<128x128xbf16, #tpu.memory_space<vmem>>, vector<128x128xbf16>
    %cst_7 = arith.constant dense<0.000000e+00> : vector<16x128xf32>
    %15 = tpu.matmul %13, %14, %cst_7 {dimension_numbers = #tpu.dot_dimension_numbers<[1], [0], [0], [1], [0, 0, 1, 1], [], []>} : vector<16x128xbf16>, vector<128x128xbf16>, vector<16x128xf32> -> vector<16x128xf32>
    %c0_8 = arith.constant 0 : index
    %c0_9 = arith.constant 0 : index
    %16 = vector.load %arg4[%c0_8, %c0_9] : memref<1x128xf32, #tpu.memory_space<vmem>>, vector<1x128xf32>
    %17 = vector.broadcast %16 : vector<1x128xf32> to vector<16x128xf32>
    %18 = arith.addf %15, %17 : vector<16x128xf32>
    %cst_10 = arith.constant 0.000000e+00 : f32
    %19 = vector.broadcast %cst_10 : f32 to vector<16x128xf32>
    %20 = arith.maximumf %18, %19 : vector<16x128xf32>
    %21 = arith.truncf %20 : vector<16x128xf32> to vector<16x128xbf16>
    %c0_11 = arith.constant 0 : index
    %c0_12 = arith.constant 0 : index
    %22 = vector.load %arg5[%c0_11, %c0_12] : memref<128x128xbf16, #tpu.memory_space<vmem>>, vector<128x128xbf16>
    %cst_13 = arith.constant dense<0.000000e+00> : vector<16x128xf32>
    %23 = tpu.matmul %21, %22, %cst_13 {dimension_numbers = #tpu.dot_dimension_numbers<[1], [0], [0], [1], [0, 0, 1, 1], [], []>} : vector<16x128xbf16>, vector<128x128xbf16>, vector<16x128xf32> -> vector<16x128xf32>
    %c0_14 = arith.constant 0 : index
    %c0_15 = arith.constant 0 : index
    %24 = vector.load %arg6[%c0_14, %c0_15] : memref<1x128xf32, #tpu.memory_space<vmem>>, vector<1x128xf32>
    %25 = vector.broadcast %24 : vector<1x128xf32> to vector<16x128xf32>
    %26 = arith.addf %23, %25 : vector<16x128xf32>
    %c0_16 = arith.constant 0 : index
    %c0_17 = arith.constant 0 : index
    %27 = vector.load %arg7[%c0_16, %c0_17] : memref<16x128xf32, #tpu.memory_space<vmem>>, vector<16x128xf32>
    tpu.vector_store %arg7[%c0_16, %c0_17], %26 {strides = array<i32>} : memref<16x128xf32, #tpu.memory_space<vmem>>, vector<16x128xf32>,
    return
  }
  func.func @transform_0(%arg0: i32) -> (i32, i32) {
    %c0_i32 = arith.constant 0 : i32
    %c0_i32_0 = arith.constant 0 : i32
    return %arg0, %c0_i32 : i32, i32
  }
  func.func @transform_1(%arg0: i32) -> (i32, i32) {
    %c0_i32 = arith.constant 0 : i32
    %c0_i32_0 = arith.constant 0 : i32
    %c0_i32_1 = arith.constant 0 : i32
    return %c0_i32, %c0_i32_0 : i32, i32
  }
  func.func @transform_2(%arg0: i32) -> (i32, i32) {
    %c0_i32 = arith.constant 0 : i32
    %c0_i32_0 = arith.constant 0 : i32
    %c0_i32_1 = arith.constant 0 : i32
    return %c0_i32, %c0_i32_0 : i32, i32
  }
  func.func @transform_3(%arg0: i32) -> (i32, i32) {
    %c0_i32 = arith.constant 0 : i32
    %c0_i32_0 = arith.constant 0 : i32
    %c0_i32_1 = arith.constant 0 : i32
    return %c0_i32, %c0_i32_0 : i32, i32
  }
  func.func @transform_4(%arg0: i32) -> (i32, i32) {
    %c0_i32 = arith.constant 0 : i32
    %c0_i32_0 = arith.constant 0 : i32
    %c0_i32_1 = arith.constant 0 : i32
    return %c0_i32, %c0_i32_0 : i32, i32
  }
  func.func @transform_5(%arg0: i32) -> (i32, i32) {
    %c0_i32 = arith.constant 0 : i32
    %c0_i32_0 = arith.constant 0 : i32
    %c0_i32_1 = arith.constant 0 : i32
    return %c0_i32, %c0_i32_0 : i32, i32
  }
  func.func @transform_6(%arg0: i32) -> (i32, i32) {
    %c0_i32 = arith.constant 0 : i32
    %c0_i32_0 = arith.constant 0 : i32
    return %arg0, %c0_i32 : i32, i32
  }
}

</mosaic_0001>

<bundles_post_ra>
// kernel: tpu_custom_call.1
= control target key start
LH: loop header
LB: loop body
LE: loop exit
PB: predicated region body
PF: predicated region fallthrough
CT: control target
= control target key end

     0   :  { %11 = vsyncpa [#allocation3], 0  ;;  %s1214_s0 = inlined_call_operand.vmem [shape: s32[16,8], index: 0, kind: input, shape index: {}]   ;;  %s1215_s1 = inlined_call_operand.hbm [shape: bf16[128,128], index: 1, kind: input, shape index: {}]   ;;  %s1216_s2 = inlined_call_operand.hbm [shape: bf16[128,128], index: 2, kind: input, shape index: {}]   ;;  %s1217_s3 = inlined_call_operand.vmem [shape: f32[1,128], index: 3, kind: input, shape index: {}]   ;;  %s1218_s4 = inlined_call_operand.hbm [shape: bf16[128,128], index: 4, kind: input, shape index: {}]   ;;  %s1219_s5 = inlined_call_operand.vmem [shape: f32[1,128], index: 5, kind: input, shape index: {}]   ;;  %s1220_s6 = inlined_call_operand.hbm [shape: f32[16,128], index: 6, kind: output, shape index: {}]  }
   0x1   :  { %12 = vsyncpa [#allocation6], 0 }
   0x2   :  { %13 = vsyncpa [#allocation4], 0  ;;  %s1009_s21 = smov [#allocation5]   ;;  %s1010_s23 = smov [#allocation2]  }
   0x3   :  { %s33_s22 = sshll.u32 %s1009_s21, 4  ;;  %s21_s24 = sshll.u32 %s1010_s23, 4  ;;  %s34_s22 = int_to_ptr.vmem [resolvable:$true] %s33_s22  ;;  %s1054_s24 = int_to_ptr.vmem [resolvable:$true] %s21_s24 }
   0x4   :  { %s915_s27 = scalar_lea.hbm %s1216_s2, 1024 }
   0x5   :  { %p916_p0 = scmp.ne.s32.totalorder %s1216_s2, %s915_s27  ;;  %p919_p1 = scmp.lt.u32.totalorder %s915_s27, %s1216_s2 }
   0x7   :  { %p921_p2 = pnand %p919_p1, %p916_p0 }
   0x9   :  { %924 = shalt.err (!%p921_p2)
}
   0xa   :  { %s925_s8 = scalar_lea.vmem %s34_s22, 1024  ;;  %p930_p4 = scmp.lt.s32.totalorder %s34_s22, %s34_s22 }
   0xb   :  { %p926_p3 = scmp.ne.s32.totalorder %s34_s22, %s925_s8  ;;  %p931_p5 = scmp.lt.s32.totalorder %s925_s8, %s925_s8 }
   0xd   :  { %p932_p6 = por %p931_p5, %p930_p4 }
   0xf   :  { %p933_p7 = pnand %p932_p6, %p926_p3 }
  0x11   :  { %936 = shalt.err (!%p933_p7)
}
  0x12   :  { %s1011_s9 = smov 64   ;;  %s1012_s10 = smov 4  }
  0x13   :  { %39 = dma.hbm_to_vmem [thread:$0]  %s1216_s2, 1024, %s34_s22, [#allocation6], %s1011_s9, %s1011_s9, %s1012_s10  }
  0x14   :  { %s937_s15 = scalar_lea.hbm %s1215_s1, 1024 }
  0x15   :  { %p938_p8 = scmp.ne.s32.totalorder %s1215_s1, %s937_s15  ;;  %p941_p9 = scmp.lt.u32.totalorder %s937_s15, %s1215_s1 }
  0x17   :  { %p943_p10 = pnand %p941_p9, %p938_p8 }
  0x19   :  { %946 = shalt.err (!%p943_p10)
}
  0x1a   :  { %s947_s20 = scalar_lea.vmem %s1054_s24, 1024  ;;  %p952_p12 = scmp.lt.s32.totalorder %s1054_s24, %s1054_s24 }
  0x1b   :  { %p948_p11 = scmp.ne.s32.totalorder %s1054_s24, %s947_s20  ;;  %p953_p13 = scmp.lt.s32.totalorder %s947_s20, %s947_s20 }
  0x1d   :  { %p954_p0 = por %p953_p13, %p952_p12 }
  0x1f   :  { %p955_p1 = pnand %p954_p0, %p948_p11 }
  0x21   :  { %958 = shalt.err (!%p955_p1)
}
  0x22   :  { %27 = dma.hbm_to_vmem [thread:$0]  %s1215_s1, 1024, %s1054_s24, [#allocation3], %s1011_s9, %s1011_s9, %s1012_s10  }
  0x23   :  { %s1013_s22 = smov [#allocation7]   ;;  %s959_s27 = scalar_lea.hbm %s1218_s4, 1024 }
  0x24   :  { %s47_s23 = sshll.u32 %s1013_s22, 4  ;;  %p960_p2 = scmp.ne.s32.totalorder %s1218_s4, %s959_s27  ;;  %s48_s23 = int_to_ptr.vmem [resolvable:$true] %s47_s23 }
  0x25   :  { %p963_p3 = scmp.lt.u32.totalorder %s959_s27, %s1218_s4 }
  0x27   :  { %p965_p4 = pnand %p963_p3, %p960_p2 }
  0x29   :  { %968 = shalt.err (!%p965_p4)
}
  0x2a   :  { %s969_s8 = scalar_lea.vmem %s48_s23, 1024  ;;  %p974_p6 = scmp.lt.s32.totalorder %s48_s23, %s48_s23 }
  0x2b   :  { %p970_p5 = scmp.ne.s32.totalorder %s48_s23, %s969_s8  ;;  %p975_p7 = scmp.lt.s32.totalorder %s969_s8, %s969_s8 }
  0x2d   :  { %p976_p8 = por %p975_p7, %p974_p6 }
  0x2f   :  { %p977_p9 = pnand %p976_p8, %p970_p5 }
  0x31   :  { %980 = shalt.err (!%p977_p9)
}
  0x32   :  { %53 = dma.hbm_to_vmem [thread:$0]  %s1218_s4, 1024, %s48_s23, [#allocation6], %s1011_s9, %s1011_s9, %s1012_s10  }
  0x33   :  { %1003 = dma.done.wait [#allocation3], 1024  }
  0x34   :  { %1004 = vsyncadd [#allocation3], 4294966272 }
  0x35   :  { %1005 = dma.done.wait [#allocation6], 2048  }
  0x36   :  { %1006 = vsyncadd [#allocation6], 4294965248  ;;  %v68_v0 = vlaneseq  ;;  %v1014_v1 = vmov 0.0   ;;  %v67_v5 = vld [vmem:[%s1214_s0 + $0x8] sm:$0xff]  ;;  %v66_v6 = vld [vmem:[%s1214_s0] sm:$0xff]  ;;  %vm1015_vm0 = vmmov 0  }
  0x37   :  { %821 = vmatprep.subr.bf16.mxu0 %v1014_v1  ;;  %841 = vmatprep.subr.bf16.mxu1 %v1014_v1  ;;  %v891_v16 = vld [vmem:[#allocation2] sm:$0xff]   ;;  %v892_v22 = vld [vmem:[#allocation2 + $0x8] sm:$0xff]   ;;  %v893_v29 = vld [vmem:[#allocation2 + $0x10] sm:$0xff]   ;;  %vm390_vm13 = vcmask 1041409   ;;  %s1016_s15 = smov [#allocation8]  }
  0x38   :  { %v71_v2 = vshrl.u32 %v68_v0, 7  ;;  %822 = vmatpush3.bf16.msra.mxu0 %v891_v16  ;;  %v894_v32 = vld [vmem:[#allocation2 + $0x18] sm:$0xff]   ;;  %v895_v33 = vld [vmem:[#allocation2 + $0x20] sm:$0xff]   ;;  %v896_v34 = vld [vmem:[#allocation2 + $0x28] sm:$0xff]   ;;  %837 = vmatprep.mubr.msk.bf16.mxu0 %vm1015_vm0, %v1014_v1  ;;  %v1134_v43 = vand.u32 127, %v68_v0  ;;  %s739_s16 = sshll.u32 %s1016_s15, 4  ;;  %s740_s16 = int_to_ptr.vmem [resolvable:$true] %s739_s16 }
  0x39   :  { %823 = vmatprep.subr.bf16.mxu0 %v1014_v1  ;;  %v897_v35 = vld [vmem:[#allocation2 + $0x30] sm:$0xff]   ;;  %v898_v36 = vld [vmem:[#allocation2 + $0x38] sm:$0xff]   ;;  %857 = vmatprep.mubr.msk.bf16.mxu1 %vm1015_vm0, %v1014_v1  ;;  %v899_v37 = vld [vmem:[#allocation5] sm:$0xff]   ;;  %p986_p11 = scmp.lt.s32.totalorder %s740_s16, %s740_s16 }
  0x3a   :  { %v72_v3 = vsub.s32 0, %v71_v2  ;;  %v79_v4 = vsub.s32 1, %v71_v2  ;;  %v86_v7 = vsub.s32 2, %v71_v2  ;;  %v93_v12 = vsub.s32 3, %v71_v2  ;;  %842 = vmatpush3.bf16.msra.mxu1 %v899_v37  ;;  %v900_v38 = vld [vmem:[#allocation5 + $0x8] sm:$0xff]   ;;  %v901_v39 = vld [vmem:[#allocation5 + $0x10] sm:$0xff]  }
  0x3b   :  { %v100_v15 = vsub.s32 4, %v71_v2  ;;  %v107_v19 = vsub.s32 5, %v71_v2  ;;  %v114_v25 = vsub.s32 6, %v71_v2  ;;  %v121_v28 = vsub.s32 7, %v71_v2  ;;  %843 = vmatprep.subr.bf16.mxu1 %v1014_v1  ;;  %v902_v40 = vld [vmem:[#allocation5 + $0x18] sm:$0xff]   ;;  %v903_v41 = vld [vmem:[#allocation5 + $0x20] sm:$0xff]  }
  0x3c   :  { %v129_v8 = vrot.slane %v67_v5, %v72_v3  ;;  %v73_v9 = vrot.slane %v66_v6, %v72_v3  ;;  %v136_v10 = vrot.slane %v67_v5, %v79_v4  ;;  %v80_v11 = vrot.slane %v66_v6, %v79_v4  ;;  %824 = vmatpush3.bf16.msra.mxu0 %v892_v22  ;;  %v904_v42 = vld [vmem:[#allocation5 + $0x28] sm:$0xff]  }
  0x3d   :  { %v143_v13 = vrot.slane %v67_v5, %v86_v7  ;;  %v87_v14 = vrot.slane %v66_v6, %v86_v7  ;;  %v150_v17 = vrot.slane %v67_v5, %v93_v12  ;;  %v94_v18 = vrot.slane %v66_v6, %v93_v12  ;;  %825 = vmatprep.subr.bf16.mxu0 %v1014_v1 }
  0x3e   :  { %131 = vbcast.lane.b32.xlu1 %v129_v8, 256  ;;  %75 = vbcast.lane.b32.xlu0 %v73_v9, 256  ;;  %v157_v20 = vrot.slane %v67_v5, %v100_v15  ;;  %v101_v21 = vrot.slane %v66_v6, %v100_v15  ;;  %v164_v23 = vrot.slane %v67_v5, %v107_v19 }
  0x3f   :  { %v108_v24 = vrot.slane %v66_v6, %v107_v19  ;;  %v171_v26 = vrot.slane %v67_v5, %v114_v25  ;;  %v115_v27 = vrot.slane %v66_v6, %v114_v25  ;;  %v178_v30 = vrot.slane %v67_v5, %v121_v28  ;;  %844 = vmatpush3.bf16.msra.mxu1 %v900_v38 }
  0x40   :  { %826 = vmatpush3.bf16.msra.mxu0 %v893_v29  ;;  %v122_v31 = vrot.slane %v66_v6, %v121_v28  ;;  %845 = vmatprep.subr.bf16.mxu1 %v1014_v1 }
  0x41   :  { %827 = vmatprep.subr.bf16.mxu0 %v1014_v1 }
  0x42   :  { %138 = vbcast.lane.b32.xlu1 %v136_v10, 256  ;;  %82 = vbcast.lane.b32.xlu0 %v80_v11, 256 }
  0x43   :  { %846 = vmatpush3.bf16.msra.mxu1 %v901_v39 }
  0x44   :  { %828 = vmatpush3.bf16.msra.mxu0 %v894_v32  ;;  %847 = vmatprep.subr.bf16.mxu1 %v1014_v1 }
  0x45   :  { %829 = vmatprep.subr.bf16.mxu0 %v1014_v1 }
  0x46   :  { %145 = vbcast.lane.b32.xlu1 %v143_v13, 256  ;;  %89 = vbcast.lane.b32.xlu0 %v87_v14, 256 }
  0x47   :  { %848 = vmatpush3.bf16.msra.mxu1 %v902_v40 }
  0x48   :  { %830 = vmatpush3.bf16.msra.mxu0 %v895_v33  ;;  %849 = vmatprep.subr.bf16.mxu1 %v1014_v1 }
  0x49   :  { %831 = vmatprep.subr.bf16.mxu0 %v1014_v1 }
  0x4a   :  { %152 = vbcast.lane.b32.xlu1 %v150_v17, 256  ;;  %96 = vbcast.lane.b32.xlu0 %v94_v18, 256 }
  0x4b   :  { %850 = vmatpush3.bf16.msra.mxu1 %v903_v41 }
  0x4c   :  { %832 = vmatpush3.bf16.msra.mxu0 %v896_v34  ;;  %851 = vmatprep.subr.bf16.mxu1 %v1014_v1 }
  0x4d   :  { %833 = vmatprep.subr.bf16.mxu0 %v1014_v1 }
  0x4e   :  { %159 = vbcast.lane.b32.xlu1 %v157_v20, 256  ;;  %103 = vbcast.lane.b32.xlu0 %v101_v21, 256 }
  0x4f   :  { %852 = vmatpush3.bf16.msra.mxu1 %v904_v42 }
  0x50   :  { %834 = vmatpush3.bf16.msra.mxu0 %v897_v35  ;;  %853 = vmatprep.subr.bf16.mxu1 %v1014_v1 }
  0x51   :  { %835 = vmatprep.subr.bf16.mxu0 %v1014_v1 }
  0x52   :  { %166 = vbcast.lane.b32.xlu1 %v164_v23, 256  ;;  %110 = vbcast.lane.b32.xlu0 %v108_v24, 256 }
  0x54   :  { %836 = vmatpush3.bf16.msra.mxu0 %v898_v36 }
  0x55   :  { %861 = vmatprep.subr.bf16.mxu0 %v1014_v1 }
  0x56   :  { %173 = vbcast.lane.b32.xlu1 %v171_v26, 256  ;;  %117 = vbcast.lane.b32.xlu0 %v115_v27, 256 }
  0x5a   :  { %180 = vbcast.lane.b32.xlu1 %v178_v30, 256  ;;  %124 = vbcast.lane.b32.xlu0 %v122_v31, 256 }
  0xb0   :  { %v132_v44 = vpop.permute.xlu1 %131  ;;  %v76_v45 = vpop.permute.xlu0 %75 }
  0xb1   :  { %vm190_vm1 = vcmp.eq.s32.totalorder %v132_v44, %v1134_v43  ;;  %vm182_vm2 = vcmp.eq.s32.totalorder %v76_v45, %v1134_v43 }
  0xb2   :  { %v760_v46 = vsel %vm190_vm1, 1.0, %v1014_v1  ;;  %v752_v47 = vsel %vm182_vm2, 1.0, %v1014_v1 }
  0xb3   :  { %v278_v48 = vrot.slane %v760_v46, 4  ;;  %v230_v49 = vrot.slane %v752_v47, 4 }
  0xb4   :  { %v139_v50 = vpop.permute.xlu1 %138  ;;  %v83_v51 = vpop.permute.xlu0 %82 }
  0xb5   :  { %vm191_vm3 = vcmp.eq.s32.totalorder %v139_v50, %v1134_v43  ;;  %vm183_vm4 = vcmp.eq.s32.totalorder %v83_v51, %v1134_v43  ;;  %v279_v52 = vadd.f32 %v760_v46, %v278_v48  ;;  %v231_v53 = vadd.f32 %v752_v47, %v230_v49 }
  0xb6   :  { %v761_v54 = vsel %vm191_vm3, 1.0, %v1014_v1  ;;  %v753_v55 = vsel %vm183_vm4, 1.0, %v1014_v1  ;;  %vm392_vm3 = vcmask 1042434   ;;  %vm394_vm4 = vcmask 1043459  }
  0xb7   :  { %v284_v56 = vrot.slane %v761_v54, 4  ;;  %v236_v57 = vrot.slane %v753_v55, 4  ;;  %v280_v62 = vrot.slane %v279_v52, 2  ;;  %v232_v63 = vrot.slane %v231_v53, 2 }
  0xb8   :  { %v146_v58 = vpop.permute.xlu1 %145  ;;  %v90_v59 = vpop.permute.xlu0 %89 }
  0xb9   :  { %v285_v60 = vadd.f32 %v761_v54, %v284_v56  ;;  %v237_v61 = vadd.f32 %v753_v55, %v236_v57  ;;  %vm192_vm5 = vcmp.eq.s32.totalorder %v146_v58, %v1134_v43  ;;  %vm184_vm6 = vcmp.eq.s32.totalorder %v90_v59, %v1134_v43 }
  0xba   :  { %v762_v3 = vsel %vm192_vm5, 1.0, %v1014_v1  ;;  %v754_v4 = vsel %vm184_vm6, 1.0, %v1014_v1  ;;  %v281_v9 = vadd.f32 %v280_v62, %v279_v52  ;;  %v233_v10 = vadd.f32 %v232_v63, %v231_v53 }
  0xbb   :  { %v286_v0 = vrot.slane %v285_v60, 2  ;;  %v238_v2 = vrot.slane %v237_v61, 2  ;;  %v290_v11 = vrot.slane %v762_v3, 4  ;;  %v242_v12 = vrot.slane %v754_v4, 4 }
  0xbc   :  { %v153_v5 = vpop.permute.xlu1 %152  ;;  %v97_v6 = vpop.permute.xlu0 %96  ;;  %v282_v19 = vrot.slane %v281_v9, 1  ;;  %v234_v20 = vrot.slane %v233_v10, 1  ;;  %vm396_vm5 = vcmask 1044484   ;;  %vm398_vm6 = vcmask 1045509  }
  0xbd   :  { %v287_v7 = vadd.f32 %v286_v0, %v285_v60  ;;  %v239_v8 = vadd.f32 %v238_v2, %v237_v61  ;;  %vm193_vm7 = vcmp.eq.s32.totalorder %v153_v5, %v1134_v43  ;;  %vm185_vm8 = vcmp.eq.s32.totalorder %v97_v6, %v1134_v43 }
  0xbe   :  { %v763_v15 = vsel %vm193_vm7, 1.0, %v1014_v1  ;;  %v755_v16 = vsel %vm185_vm8, 1.0, %v1014_v1  ;;  %v291_v25 = vadd.f32 %v762_v3, %v290_v11  ;;  %v243_v26 = vadd.f32 %v754_v4, %v242_v12 }
  0xbf   :  { %v288_v13 = vrot.slane %v287_v7, 1  ;;  %v240_v14 = vrot.slane %v239_v8, 1  ;;  %v296_v21 = vrot.slane %v763_v15, 4  ;;  %v248_v22 = vrot.slane %v755_v16, 4 }
  0xc0   :  { %v160_v17 = vpop.permute.xlu1 %159  ;;  %v104_v18 = vpop.permute.xlu0 %103  ;;  %v283_v31 = vadd.f32 %v282_v19, %v281_v9  ;;  %v235_v32 = vadd.f32 %v234_v20, %v233_v10  ;;  %v292_v39 = vrot.slane %v291_v25, 2  ;;  %v244_v40 = vrot.slane %v243_v26, 2 }
  0xc1   :  { %vm194_vm9 = vcmp.eq.s32.totalorder %v160_v17, %v1134_v43  ;;  %vm186_vm10 = vcmp.eq.s32.totalorder %v104_v18, %v1134_v43  ;;  %v289_v23 = vadd.f32 %v288_v13, %v287_v7  ;;  %v241_v24 = vadd.f32 %v240_v14, %v239_v8 }
  0xc2   :  { %v764_v27 = vsel %vm194_vm9, 1.0, %v1014_v1  ;;  %v756_v28 = vsel %vm186_vm10, 1.0, %v1014_v1  ;;  %v297_v33 = vadd.f32 %v763_v15, %v296_v21  ;;  %v249_v34 = vadd.f32 %v755_v16, %v248_v22 }
  0xc3   :  { %v302_v35 = vrot.slane %v764_v27, 4  ;;  %v254_v36 = vrot.slane %v756_v28, 4  ;;  %v335_v37 = vpack.c.bf16 %v289_v23, %v289_v23  ;;  %v327_v38 = vpack.c.bf16 %v241_v24, %v241_v24 }
  0xc4   :  { %v167_v29 = vpop.permute.xlu1 %166  ;;  %v111_v30 = vpop.permute.xlu0 %110  ;;  %v334_v44 = vpack.c.bf16 %v283_v31, %v283_v31  ;;  %v326_v45 = vpack.c.bf16 %v235_v32, %v235_v32  ;;  %v298_v46 = vrot.slane %v297_v33, 2  ;;  %v250_v47 = vrot.slane %v249_v34, 2 }
  0xc5   :  { %v303_v41 = vadd.f32 %v764_v27, %v302_v35  ;;  %v255_v42 = vadd.f32 %v756_v28, %v254_v36  ;;  %vm195_vm11 = vcmp.eq.s32.totalorder %v167_v29, %v1134_v43  ;;  %vm187_vm12 = vcmp.eq.s32.totalorder %v111_v30, %v1134_v43 }
  0xc6   :  { %v765_v50 = vsel %vm195_vm11, 1.0, %v1014_v1  ;;  %v757_v51 = vsel %vm187_vm12, 1.0, %v1014_v1  ;;  %v293_v54 = vadd.f32 %v292_v39, %v291_v25  ;;  %v245_v55 = vadd.f32 %v244_v40, %v243_v26 }
  0xc7   :  { %v304_v48 = vrot.slane %v303_v41, 2  ;;  %v256_v49 = vrot.slane %v255_v42, 2  ;;  %v383_v56 = vunpack.c.l.b16 %v335_v37  ;;  %v375_v57 = vunpack.c.l.b16 %v327_v38 }
  0xc8   :  { %v174_v52 = vpop.permute.xlu1 %173  ;;  %v118_v53 = vpop.permute.xlu0 %117  ;;  %v308_v58 = vrot.slane %v765_v50, 4  ;;  %v260_v59 = vrot.slane %v757_v51, 4  ;;  %v382_v60 = vunpack.c.l.b16 %v334_v44  ;;  %v374_v61 = vunpack.c.l.b16 %v326_v45 }
  0xc9   :  { %v299_v62 = vadd.f32 %v298_v46, %v297_v33  ;;  %v251_v63 = vadd.f32 %v250_v47, %v249_v34  ;;  %v305_v0 = vadd.f32 %v304_v48, %v303_v41  ;;  %v257_v2 = vadd.f32 %v256_v49, %v255_v42 }
  0xca   :  { %v309_v3 = vadd.f32 %v765_v50, %v308_v58  ;;  %v261_v4 = vadd.f32 %v757_v51, %v260_v59  ;;  %v294_v5 = vrot.slane %v293_v54, 1  ;;  %v246_v6 = vrot.slane %v245_v55, 1 }
  0xcb   :  { %vm196_vm14 = vcmp.eq.s32.totalorder %v174_v52, %v1134_v43  ;;  %vm188_vm15 = vcmp.eq.s32.totalorder %v118_v53, %v1134_v43  ;;  %v1163_v7 = vsel %vm390_vm13, %v383_v56, %v382_v60  ;;  %v1166_v8 = vsel %vm390_vm13, %v375_v57, %v374_v61 }
  0xcc   :  { %v310_v9 = vrot.slane %v309_v3, 2  ;;  %v262_v10 = vrot.slane %v261_v4, 2  ;;  %v181_v11 = vpop.permute.xlu1 %180  ;;  %v125_v12 = vpop.permute.xlu0 %124  ;;  %v300_v13 = vrot.slane %v299_v62, 1  ;;  %v252_v14 = vrot.slane %v251_v63, 1 }
  0xcd   :  { %v766_v15 = vsel %vm196_vm14, 1.0, %v1014_v1  ;;  %v758_v16 = vsel %vm188_vm15, 1.0, %v1014_v1  ;;  %v306_v17 = vrot.slane %v305_v0, 1  ;;  %v258_v18 = vrot.slane %v257_v2, 1 }
  0xce   :  { %v311_v19 = vadd.f32 %v310_v9, %v309_v3  ;;  %v263_v20 = vadd.f32 %v262_v10, %v261_v4  ;;  %v314_v21 = vrot.slane %v766_v15, 4  ;;  %v266_v22 = vrot.slane %v758_v16, 4 }
  0xcf   :  { %vm197_vm1 = vcmp.eq.s32.totalorder %v181_v11, %v1134_v43  ;;  %vm189_vm2 = vcmp.eq.s32.totalorder %v125_v12, %v1134_v43  ;;  %v295_v23 = vadd.f32 %v294_v5, %v293_v54  ;;  %v247_v24 = vadd.f32 %v246_v6, %v245_v55 }
  0xd0   :  { %v312_v25 = vrot.slane %v311_v19, 1  ;;  %v264_v26 = vrot.slane %v263_v20, 1  ;;  %v315_v27 = vadd.f32 %v766_v15, %v314_v21  ;;  %v267_v28 = vadd.f32 %v758_v16, %v266_v22 }
  0xd1   :  { %v767_v29 = vsel %vm197_vm1, 1.0, %v1014_v1  ;;  %v759_v30 = vsel %vm189_vm2, 1.0, %v1014_v1  ;;  %v301_v31 = vadd.f32 %v300_v13, %v299_v62  ;;  %v253_v32 = vadd.f32 %v252_v14, %v251_v63 }
  0xd2   :  { %v320_v33 = vrot.slane %v767_v29, 4  ;;  %v272_v34 = vrot.slane %v759_v30, 4  ;;  %v307_v35 = vadd.f32 %v306_v17, %v305_v0  ;;  %v259_v36 = vadd.f32 %v258_v18, %v257_v2 }
  0xd3   :  { %v316_v37 = vrot.slane %v315_v27, 2  ;;  %v268_v43 = vrot.slane %v267_v28, 2  ;;  %v313_v38 = vadd.f32 %v312_v25, %v311_v19  ;;  %v265_v39 = vadd.f32 %v264_v26, %v263_v20 }
  0xd4   :  { %v321_v40 = vadd.f32 %v767_v29, %v320_v33  ;;  %v273_v41 = vadd.f32 %v759_v30, %v272_v34  ;;  %v336_v42 = vpack.c.bf16 %v295_v23, %v295_v23  ;;  %v328_v44 = vpack.c.bf16 %v247_v24, %v247_v24  ;;  %v907_v33 = vld [vmem:[#allocation7] sm:$0xff]   ;;  %v908_v34 = vld [vmem:[#allocation7 + $0x8] sm:$0xff]  }
  0xd5   :  { %v317_v45 = vadd.f32 %v316_v37, %v315_v27  ;;  %v269_v46 = vadd.f32 %v268_v43, %v267_v28  ;;  %v337_v47 = vpack.c.bf16 %v301_v31, %v301_v31  ;;  %v329_v48 = vpack.c.bf16 %v253_v32, %v253_v32  ;;  %v905_v31 = vld [vmem:[#allocation5 + $0x30] sm:$0xff]   ;;  %v906_v32 = vld [vmem:[#allocation5 + $0x38] sm:$0xff]   ;;  %v911_v37 = vld [vmem:[#allocation7 + $0x20] sm:$0xff]  }
  0xd6   :  { %v322_v49 = vrot.slane %v321_v40, 2  ;;  %v274_v50 = vrot.slane %v273_v41, 2  ;;  %vm400_vm7 = vcmask 1046534   ;;  %v338_v51 = vpack.c.bf16 %v307_v35, %v307_v35  ;;  %854 = vmatpush3.bf16.msra.mxu1 %v905_v31  ;;  %v909_v35 = vld [vmem:[#allocation7 + $0x10] sm:$0xff]   ;;  %v912_v43 = vld [vmem:[#allocation7 + $0x28] sm:$0xff]  }
  0xd7   :  { %v330_v52 = vpack.c.bf16 %v259_v36, %v259_v36  ;;  %v318_v53 = vrot.slane %v317_v45, 1  ;;  %v270_v54 = vrot.slane %v269_v46, 1  ;;  %v339_v55 = vpack.c.bf16 %v313_v38, %v313_v38  ;;  %855 = vmatprep.subr.bf16.mxu1 %v1014_v1  ;;  %v910_v36 = vld [vmem:[#allocation7 + $0x18] sm:$0xff]  }
  0xd8   :  { %v331_v56 = vpack.c.bf16 %v265_v39, %v265_v39  ;;  %v323_v57 = vadd.f32 %v322_v49, %v321_v40  ;;  %v275_v58 = vadd.f32 %v274_v50, %v273_v41  ;;  %v384_v59 = vunpack.c.l.b16 %v336_v42 }
  0xd9   :  { %v376_v60 = vunpack.c.l.b16 %v328_v44  ;;  %v319_v61 = vadd.f32 %v318_v53, %v317_v45  ;;  %v271_v62 = vadd.f32 %v270_v54, %v269_v46  ;;  %v385_v63 = vunpack.c.l.b16 %v337_v47  ;;  %v913_v46 = vld [vmem:[#allocation7 + $0x30] sm:$0xff]   ;;  %v914_v47 = vld [vmem:[#allocation7 + $0x38] sm:$0xff]  }
  0xda   :  { %v377_v0 = vunpack.c.l.b16 %v329_v48  ;;  %v324_v2 = vrot.slane %v323_v57, 1  ;;  %v276_v3 = vrot.slane %v275_v58, 1  ;;  %v386_v4 = vunpack.c.l.b16 %v338_v51  ;;  %856 = vmatpush3.bf16.msra.mxu1 %v906_v32  ;;  %v776_v48 = vld [vmem:[%s1217_s3] ss:$0 sm:$0xff]  ;;  %s981_s3 = scalar_lea.vmem %s740_s16, 256 }
  0xdb   :  { %v378_v5 = vunpack.c.l.b16 %v330_v52  ;;  %v340_v6 = vpack.c.bf16 %v319_v61, %v319_v61  ;;  %v332_v9 = vpack.c.bf16 %v271_v62, %v271_v62  ;;  %v387_v10 = vunpack.c.l.b16 %v339_v55  ;;  %p982_p10 = scmp.ne.s32.totalorder %s740_s16, %s981_s3  ;;  %p987_p12 = scmp.lt.s32.totalorder %s981_s3, %s981_s3 }
  0xdc   :  { %v379_v11 = vunpack.c.l.b16 %v331_v56  ;;  %v325_v12 = vadd.f32 %v324_v2, %v323_v57  ;;  %v277_v13 = vadd.f32 %v276_v3, %v275_v58  ;;  %v405_v14 = vsel %vm392_vm3, %v384_v59, %v1163_v7 }
  0xdd   :  { %v393_v15 = vsel %vm392_vm3, %v376_v60, %v1166_v8  ;;  %v388_v16 = vunpack.c.l.b16 %v340_v6  ;;  %v380_v17 = vunpack.c.l.b16 %v332_v9  ;;  %v406_v18 = vsel %vm394_vm4, %v385_v63, %v405_v14  ;;  %p988_p13 = por %p987_p12, %p986_p11 }
  0xde   :  { %v395_v19 = vsel %vm394_vm4, %v377_v0, %v393_v15  ;;  %v341_v20 = vpack.c.bf16 %v325_v12, %v325_v12  ;;  %v333_v21 = vpack.c.bf16 %v277_v13, %v277_v13  ;;  %vm402_vm8 = vcmask 1047559  }
  0xdf   :  { %v397_v22 = vsel %vm396_vm5, %v378_v5, %v395_v19  ;;  %v407_v23 = vsel %vm396_vm5, %v386_v4, %v406_v18  ;;  %p989_p0 = pnand %p988_p13, %p982_p10 }
  0xe0   :  { %v389_v24 = vunpack.c.l.b16 %v341_v20  ;;  %v381_v25 = vunpack.c.l.b16 %v333_v21  ;;  %v399_v7 = vsel %vm398_vm6, %v379_v11, %v397_v22  ;;  %v408_v26 = vsel %vm398_vm6, %v387_v10, %v407_v23 }
  0xe1   :  { %v401_v8 = vsel %vm400_vm7, %v380_v17, %v399_v7  ;;  %v409_v27 = vsel %vm400_vm7, %v388_v16, %v408_v26 }
  0xe2   :  { %v403_v28 = vsel %vm402_vm8, %v381_v25, %v401_v8  ;;  %v410_v29 = vsel %vm402_vm8, %v389_v24, %v409_v27 }
  0xe3   :  { %v411_v30 = vpack.c.b16 %v410_v29, %v403_v28 }
  0xe5   :  { %838 = vmatmul.mubr.bf16.vlgmr.msra.gmra.mrb[0].mxu0 %v411_v30 }
  0xe6   :  { %877 = vmatprep.mubr.msk.bf16.mxu0 %vm1015_vm0, %v1014_v1  ;;  %862 = vmatpush3.bf16.msra.mxu0 %v907_v33 }
  0xe7   :  { %863 = vmatprep.subr.bf16.mxu0 %v1014_v1 }
  0xea   :  { %864 = vmatpush3.bf16.msra.mxu0 %v908_v34 }
  0xeb   :  { %865 = vmatprep.subr.bf16.mxu0 %v1014_v1 }
  0xee   :  { %866 = vmatpush3.bf16.msra.mxu0 %v909_v35 }
  0xef   :  { %867 = vmatprep.subr.bf16.mxu0 %v1014_v1 }
  0xf2   :  { %868 = vmatpush3.bf16.msra.mxu0 %v910_v36 }
  0xf3   :  { %869 = vmatprep.subr.bf16.mxu0 %v1014_v1 }
  0xf6   :  { %870 = vmatpush3.bf16.msra.mxu0 %v911_v37 }
  0xf7   :  { %871 = vmatprep.subr.bf16.mxu0 %v1014_v1 }
  0xfa   :  { %872 = vmatpush3.bf16.msra.mxu0 %v912_v43 }
  0xfb   :  { %873 = vmatprep.subr.bf16.mxu0 %v1014_v1 }
  0xfe   :  { %874 = vmatpush3.bf16.msra.mxu0 %v913_v46 }
  0xff   :  { %875 = vmatprep.subr.bf16.mxu0 %v1014_v1  ;;  %v785_v1 = vld [vmem:[%s1219_s5] ss:$0 sm:$0xff] }
 0x102   :  { %876 = vmatpush3.bf16.msra.mxu0 %v914_v47 }
 0x1b8   :  { %v495_v38 = vpop.f32.mrb[0].mxu0 }
 0x1b9   :  { %v839_v39 = vpop.f32.mrb[1].mxu0  ;;  %v502_v41 = vmul.f32 0.125, %v495_v38 }
 0x1ba   :  { %v498_v40 = vpop.f32.mrb[2].mxu0 }
 0x1bb   :  { %v503_v42 = vmul.f32 0.125, %v498_v40  ;;  %v840_v44 = vpop.f32.mrb[3].mxu0 }
 0x1bd   :  { %v504_v45 = vpack.c.bf16 %v503_v42, %v502_v41 }
 0x1bf   :  { %858 = vmatmul.mubr.bf16.vlgmr.msra.gmra.mrb[0].mxu1 %v504_v45 }
 0x292   :  { %v610_v49 = vpop.f32.mrb[0].mxu1 }
 0x293   :  { %v611_v50 = vadd.f32 %v776_v48, %v610_v49  ;;  %v859_v51 = vpop.f32.mrb[1].mxu1 }
 0x294   :  { %v613_v52 = vpop.f32.mrb[2].mxu1 }
 0x295   :  { %v614_v53 = vadd.f32 %v776_v48, %v613_v52  ;;  %v860_v54 = vpop.f32.mrb[3].mxu1  ;;  %v617_v55 = vmax.f32 %v611_v50, 0.0 }
 0x297   :  { %v618_v56 = vmax.f32 %v614_v53, 0.0 }
 0x299   :  { %v619_v57 = vpack.c.bf16 %v618_v56, %v617_v55 }
 0x29b   :  { %878 = vmatmul.mubr.bf16.vlgmr.msra.gmra.mrb[4].mxu0 %v619_v57 }
 0x36e   :  { %v725_v58 = vpop.f32.mrb[4].mxu0 }
 0x36f   :  { %v726_v59 = vadd.f32 %v785_v1, %v725_v58  ;;  %v879_v60 = vpop.f32.mrb[5].mxu0 }
 0x370   :  { %v728_v61 = vpop.f32.mrb[6].mxu0 }
 0x371   :  { %732 = vst [vmem:[#allocation8] sm:$0xff] %v726_v59  ;;  %v729_v62 = vadd.f32 %v785_v1, %v728_v61  ;;  %v880_v63 = vpop.f32.mrb[7].mxu0 }
 0x373   :  { %733 = vst [vmem:[#allocation8 + $0x8] sm:$0xff] %v729_v62 }
 0x374   :  { %992 = shalt.err (!%p989_p0)
}
 0x375   :  { %s993_s18 = scalar_lea.hbm %s1220_s6, 256 }
 0x376   :  { %p994_p1 = scmp.ne.s32.totalorder %s1220_s6, %s993_s18  ;;  %p997_p2 = scmp.lt.u32.totalorder %s993_s18, %s1220_s6 }
 0x378   :  { %p999_p3 = pnand %p997_p2, %p994_p1 }
 0x37a   :  { %1002 = shalt.err (!%p999_p3)
}
 0x37b   :  { %s1017_s22 = smov 128   ;;  %s1018_s23 = smov 8  }
 0x37c   :  { %745 = dma.vmem_to_hbm [thread:$0]  %s740_s16, 256, %s1220_s6, [#allocation4], %s1017_s22, %s1017_s22, %s1018_s23  }
 0x37d   :  { %1007 = dma.done.wait [#allocation4], 256  }
 0x37e   :  { %1008 = vsyncadd [#allocation4], 4294967040 }
 0x37f   :  { %749 = vsyncpa [#allocation3], 1 }
 0x380   :  { %750 = vsyncpa [#allocation6], 1 }
 0x381   :  { %751 = vsyncpa [#allocation4], 1 }

</bundles_post_ra>
